<compile_context>
chip_gen: v6e
topology: v6e:2x2x1
jax: 0.10.0
libtpu: 0.0.40
codegen_flags: <defaults>
</compile_context>

<pallas_src>
import math
import numpy as np
import jax
import jax.numpy as jnp
from jax.experimental import pallas as pl
from jax.experimental.pallas import tpu as pltpu


def _upsample_concat_kernel(x0_ref, x1_ref, sel_ref, out_ref):
    # x0_ref : (1, tc, r_h*r_w)   channel-flattened low-res block
    # x1_ref : (1, tc, h*w)       channel-flattened skip block
    # sel_ref: (r_h*r_w, h*w)     one-hot nearest-neighbour selector (resident)
    # out_ref: (1, 2, tc, h*w)    out[0,0]=upsampled, out[0,1]=skip passthrough
    acc_dtype = x0_ref.dtype  # one-hot selection is exact; no f32 upcast needed
    up = jnp.dot(x0_ref[0], sel_ref[...], preferred_element_type=acc_dtype)
    out_ref[0, 0] = up.astype(out_ref.dtype)
    out_ref[0, 1] = x1_ref[0].astype(out_ref.dtype)


def _nearest_src_indices(out_size, in_size):
    # Matches PyTorch nn.Upsample(mode='nearest'):
    #   src = min(int(dst * in_size / out_size), in_size - 1)
    scale = in_size / out_size
    return np.minimum((np.arange(out_size) * scale).astype(np.int64), in_size - 1)


def _pick_channel_tile(c, r_hw, hw, in_item, out_item, sel_bytes,
                       budget_bytes=36 * 2 ** 20):
    """Largest channel tile whose double-buffered block set fits the budget."""
    budget = max(budget_bytes - 2 * sel_bytes, 4 * 2 ** 20)
    per_ch = 2 * (r_hw * in_item + hw * in_item + 2 * hw * out_item)  # 2x = dbl-buf
    tc = max(int(budget // per_ch), 1)
    if tc >= c:
        return c
    tc = (tc // 8) * 8          # sublane alignment for a partial channel block
    while tc >= 8 and c % tc:   # must divide c evenly
        tc -= 8
    return tc if tc >= 8 else c


def upsample_concat(x0, x1, dimension=1, upsample_mode='nearest'):
    """Pallas implementation of Upsample_Concat.forward([x0, x1])."""
    assert dimension == 1, "only channel concat (d=1) implemented"
    assert upsample_mode == 'nearest'  # TODO(synk): bilinear and other modes not implemented
    bs1, c, h, w = x1.shape
    bs, u_c, u_h, u_w = x0.shape
    assert bs == bs1

    # --- glue: channel-bias flatten/reshape (pure reshape/slice, no compute) ---
    if u_c != c:
        if u_c % c == 0 and math.isqrt(u_c // c) ** 2 == (u_c // c):
            c_d = math.isqrt(u_c // c)                       # exact integer path
            r_h, r_w = c_d * u_h, c_d * u_w
        else:                                                # PyTorch float path
            c_d = math.sqrt(u_c / c)
            r_h, r_w = int(c_d * u_h), int(c_d * u_w)
        assert bs * c * r_h * r_w <= x0.size, "channel-bias reshape out of range"
        x0 = x0.reshape(-1)[: bs * c * r_h * r_w].reshape(bs, c, r_h, r_w)
    else:
        r_h, r_w = u_h, u_w

    r_hw, hw = r_h * r_w, h * w
    x0_flat = x0.reshape(bs, c, r_hw)          # lane-dense last dim
    x1_flat = x1.reshape(bs, c, hw)

    # --- glue: fused Kronecker one-hot selector  S: (r_h*r_w, h*w) ---
    # up_flat[c, i*w+j] = x0_flat[c, src_h[i]*r_w + src_w[j]]  ->  up = x0_flat @ S
    # TODO(synk): for very large resolutions S gets big; fall back to factorized
    # (c*r_h, r_w)@(r_w, w) matmuls in that regime.
    src_h = _nearest_src_indices(h, r_h)
    src_w = _nearest_src_indices(w, r_w)
    sel_h = np.zeros((h, r_h), np.float32); sel_h[np.arange(h), src_h] = 1.0
    sel_w = np.zeros((w, r_w), np.float32); sel_w[np.arange(w), src_w] = 1.0
    sel = jnp.asarray(np.kron(sel_h, sel_w).T, dtype=x0.dtype)   # (r_hw, hw)

    out_dtype = x1.dtype          # matches torch.cat (inputs share dtype)
    in_item = jnp.dtype(x0.dtype).itemsize
    out_item = jnp.dtype(out_dtype).itemsize
    sel_bytes = r_hw * hw * in_item

    tc = _pick_channel_tile(c, r_hw, hw, in_item, out_item, sel_bytes)
    per_step = 2 * (tc * r_hw * in_item + tc * hw * in_item
                    + 2 * tc * hw * out_item) + 2 * sel_bytes
    vmem_limit = int(min(64 * 2 ** 20, max(32 * 2 ** 20, 2 * per_step)))

    out = pl.pallas_call(
        _upsample_concat_kernel,
        out_shape=jax.ShapeDtypeStruct((bs, 2, c, hw), out_dtype),
        grid_spec=pltpu.PrefetchScalarGridSpec(
            num_scalar_prefetch=0,
            grid=(bs, c // tc),
            in_specs=[
                pl.BlockSpec((1, tc, r_hw), lambda b, ci: (b, ci, 0)),
                pl.BlockSpec((1, tc, hw), lambda b, ci: (b, ci, 0)),
                pl.BlockSpec((r_hw, hw), lambda b, ci: (0, 0)),   # resident
            ],
            out_specs=pl.BlockSpec((1, 2, tc, hw), lambda b, ci: (b, 0, ci, 0)),
        ),
        compiler_params=pltpu.CompilerParams(
            dimension_semantics=("parallel", "parallel"),
            vmem_limit_bytes=vmem_limit,
        ),
    )(x0_flat, x1_flat, sel)

    # (bs, 2, c, h*w) -> (bs, 2c, h, w): channels 0..c-1 = upsampled, c..2c-1 = x1
    return out.reshape(bs, 2 * c, h, w)


def _reference(x0, x1):
    """Pure-JAX reference reproducing the PyTorch forward semantics."""
    _, c, h, w = x1.shape
    bs, u_c, u_h, u_w = x0.shape
    if u_c != c:
        c_d = math.sqrt(u_c / c)
        r_h, r_w = int(c_d * u_h), int(c_d * u_w)
        x0 = x0.reshape(-1)[: bs * c * r_h * r_w].reshape(bs, c, r_h, r_w)
    else:
        r_h, r_w = u_h, u_w
    src_h = _nearest_src_indices(h, r_h)
    src_w = _nearest_src_indices(w, r_w)
    up = x0[:, :, src_h, :][:, :, :, src_w]
    return jnp.concatenate([up, x1], axis=1)


if __name__ == "__main__":
    key = jax.random.PRNGKey(0)
    k0, k1, k2 = jax.random.split(key, 3)

    # Case 1 (f32): channel_bias = 16/4 = 4 -> reshape (2,16,8,8)->(2,4,16,16),
    # nearest-upsample to (32,32), concat -> (2,8,32,32).
    x0 = jax.random.normal(k0, (2, 16, 8, 8), dtype=jnp.float32)
    x1 = jax.random.normal(k1, (2, 4, 32, 32), dtype=jnp.float32)
    out = jax.block_until_ready(upsample_concat(x0, x1))
    ref = _reference(x0, x1)
    assert out.shape == (2, 8, 32, 32), out.shape
    assert jnp.allclose(out, ref, atol=1e-5, rtol=1e-5), "mismatch vs reference (f32)"

    # Case 2 (bf16, no channel reshape): (2,4,16,16) -> upsample (32,32) -> (2,8,32,32).
    x0b = jax.random.normal(k2, (2, 4, 16, 16), dtype=jnp.bfloat16)
    x1b = jax.random.normal(k1, (2, 4, 32, 32), dtype=jnp.bfloat16)
    outb = jax.block_until_ready(upsample_concat(x0b, x1b))
    refb = _reference(x0b, x1b)
    assert outb.shape == (2, 8, 32, 32), outb.shape
    assert jnp.array_equal(outb, refb), "mismatch vs reference (bf16, exact expected)"

    print("KERNEL_OK")
</pallas_src>

<mosaic_0001>
module attributes {stable_mosaic.version = 11 : i64} {
  func.func @_upsample_concat_kernel(%arg0: i32, %arg1: i32, %arg2: memref<1x4x256xf32, #tpu.memory_space<vmem>>, %arg3: memref<1x4x1024xf32, #tpu.memory_space<vmem>>, %arg4: memref<256x1024xf32, #tpu.memory_space<vmem>>, %arg5: memref<1x2x4x1024xf32, #tpu.memory_space<vmem>>) attributes {dimension_semantics = [#tpu.dimension_semantics<parallel>, #tpu.dimension_semantics<parallel>], iteration_bounds = array<i64: 2, 1>, scalar_prefetch = 0 : i64, scratch_operands = 0 : i64, tpu.core_type = #tpu.core_type<tc>, window_params = [{transform_indices = @transform_0, window_bounds = array<i64: 1, 4, 256>}, {transform_indices = @transform_1, window_bounds = array<i64: 1, 4, 1024>}, {pipeline_mode = #tpu.pipeline_mode<synchronous>, transform_indices = @transform_2, window_bounds = array<i64: 256, 1024>}, {transform_indices = @transform_3, window_bounds = array<i64: 1, 2, 4, 1024>}]} {
    %c0 = arith.constant 0 : index
    %c0_0 = arith.constant 0 : index
    %c0_1 = arith.constant 0 : index
    %0 = vector.load %arg2[%c0, %c0_0, %c0_1] : memref<1x4x256xf32, #tpu.memory_space<vmem>>, vector<1x4x256xf32>
    %1 = vector.shape_cast %0 : vector<1x4x256xf32> to vector<4x256xf32>
    %c0_2 = arith.constant 0 : index
    %c0_3 = arith.constant 0 : index
    %2 = vector.load %arg4[%c0_2, %c0_3] : memref<256x1024xf32, #tpu.memory_space<vmem>>, vector<256x1024xf32>
    %cst = arith.constant dense<0.000000e+00> : vector<4x1024xf32>
    %3 = tpu.matmul %1, %2, %cst {dimension_numbers = #tpu.dot_dimension_numbers<[1], [0], [0], [1], [0, 0, 1, 1], [], []>} : vector<4x256xf32>, vector<256x1024xf32>, vector<4x1024xf32> -> vector<4x1024xf32>
    %c0_4 = arith.constant 0 : index
    %c0_5 = arith.constant 0 : index
    %c0_6 = arith.constant 0 : index
    %c0_7 = arith.constant 0 : index
    %4 = vector.load %arg5[%c0_4, %c0_5, %c0_6, %c0_7] : memref<1x2x4x1024xf32, #tpu.memory_space<vmem>>, vector<1x1x4x1024xf32>
    %5 = vector.shape_cast %4 : vector<1x1x4x1024xf32> to vector<4x1024xf32>
    %6 = vector.shape_cast %3 : vector<4x1024xf32> to vector<1x1x4x1024xf32>
    tpu.vector_store %arg5[%c0_4, %c0_5, %c0_6, %c0_7], %6 {strides = array<i32>} : memref<1x2x4x1024xf32, #tpu.memory_space<vmem>>, vector<1x1x4x1024xf32>,
    %c0_8 = arith.constant 0 : index
    %c0_9 = arith.constant 0 : index
    %c0_10 = arith.constant 0 : index
    %7 = vector.load %arg3[%c0_8, %c0_9, %c0_10] : memref<1x4x1024xf32, #tpu.memory_space<vmem>>, vector<1x4x1024xf32>
    %8 = vector.shape_cast %7 : vector<1x4x1024xf32> to vector<4x1024xf32>
    %c0_11 = arith.constant 0 : index
    %c1 = arith.constant 1 : index
    %c0_12 = arith.constant 0 : index
    %c0_13 = arith.constant 0 : index
    %9 = vector.load %arg5[%c0_11, %c1, %c0_12, %c0_13] : memref<1x2x4x1024xf32, #tpu.memory_space<vmem>>, vector<1x1x4x1024xf32>
    %10 = vector.shape_cast %9 : vector<1x1x4x1024xf32> to vector<4x1024xf32>
    %11 = vector.shape_cast %8 : vector<4x1024xf32> to vector<1x1x4x1024xf32>
    tpu.vector_store %arg5[%c0_11, %c1, %c0_12, %c0_13], %11 {strides = array<i32>} : memref<1x2x4x1024xf32, #tpu.memory_space<vmem>>, vector<1x1x4x1024xf32>,
    return
  }
  func.func @transform_0(%arg0: i32, %arg1: i32) -> (i32, i32, i32) {
    %c0_i32 = arith.constant 0 : i32
    %c0_i32_0 = arith.constant 0 : i32
    return %arg0, %arg1, %c0_i32 : i32, i32, i32
  }
  func.func @transform_1(%arg0: i32, %arg1: i32) -> (i32, i32, i32) {
    %c0_i32 = arith.constant 0 : i32
    %c0_i32_0 = arith.constant 0 : i32
    return %arg0, %arg1, %c0_i32 : i32, i32, i32
  }
  func.func @transform_2(%arg0: i32, %arg1: i32) -> (i32, i32) {
    %c0_i32 = arith.constant 0 : i32
    %c0_i32_0 = arith.constant 0 : i32
    %c0_i32_1 = arith.constant 0 : i32
    return %c0_i32, %c0_i32_0 : i32, i32
  }
  func.func @transform_3(%arg0: i32, %arg1: i32) -> (i32, i32, i32, i32) {
    %c0_i32 = arith.constant 0 : i32
    %c0_i32_0 = arith.constant 0 : i32
    %c0_i32_1 = arith.constant 0 : i32
    return %arg0, %c0_i32, %arg1, %c0_i32_0 : i32, i32, i32, i32
  }
}

</mosaic_0001>

<bundles_post_ra>
// kernel: tpu_custom_call.1
= control target key start
LH: loop header
LB: loop body
LE: loop exit
PB: predicated region body
PF: predicated region fallthrough
CT: control target
= control target key end

     0   :  { %s1508_s0 = inlined_call_operand.hbm [shape: f32[2,4,256], index: 0, kind: input, shape index: {}]   ;;  %s1509_s1 = inlined_call_operand.hbm [shape: f32[2,4,1024], index: 1, kind: input, shape index: {}]   ;;  %s1510_s2 = inlined_call_operand.hbm [shape: f32[256,1024], index: 2, kind: input, shape index: {}]   ;;  %s1511_s3 = inlined_call_operand.hbm [shape: f32[2,2,4,1024], index: 3, kind: output, shape index: {}]  }
   0x1   :  { %1513 = sst [smem:[#allocation14_spill]] %s1508_s0 }
   0x2   :  { %1514 = sst [smem:[#allocation15_spill]] %s1510_s2 }
   0x3   :  { %8 = vsyncpa [#allocation3], 0 }
   0x4   :  { %10 = vsyncpa [#allocation3 + $0x1], 0 }
   0x5   :  { %11 = vsyncpa [#allocation6], 0 }
   0x6   :  { %13 = vsyncpa [#allocation6 + $0x1], 0 }
   0x7   :  { %14 = vsyncpa [#allocation4], 0 }
   0x8   :  { %16 = vsyncpa [#allocation4 + $0x1], 0  ;;  %s1283_s12 = smov 0   ;;  %s1285_s13 = smov 0  }
   0x9   :  { %s1287_s14 = smov 0   ;;  %s1289_s15 = smov 0  }
   0xa   :  { %s1291_s16 = smov 0   ;;  %s1293_s17 = smov 0  }
   0xb LB: > { %s1314_s18 = sadd.s32 4294967295, %s1253_s17   ;;  %s973_s19 = sadd.s32 4294967294, %s1253_s17   ;;  %s1253_s17 = sphi %s1293_s17, %s22_s17   ;;  %s1249_s16 = sphi %s1291_s16, %s1532_s16   ;;  %s1245_s15 = sphi %s1289_s15, %s1531_s15   ;;  %s1241_s14 = sphi %s1287_s14, %s1530_s14   ;;  %s1237_s13 = sphi %s1285_s13, %s1529_s13   ;;  %s1233_s12 = sphi %s1283_s12, %s1528_s12  }
   0xc   : > { %p56_p0 = scmp.ne.s32.totalorder %s1237_s13, %s1233_s12  ;;  %p57_p1 = scmp.eq.s32.totalorder %s1314_s18, 0 }
   0xd   : > { %p137_p3 = scmp.eq.s32.totalorder %s973_s19, 1  ;;  %p974_p5 = scmp.ge.s32.totalorder %s1253_s17, 1 }
   0xe   : > { %p1323_p4 = por %p57_p1, %p56_p0  ;;  %p144_p7 = scmp.lt.s32.totalorder %s1253_s17, 3 }
   0xf   : > { %p1328_p6 = por %p137_p3, %p56_p0  ;;  %s1255_s23 = smov [#allocation7]  }
  0x10   : > { %p1333_p8 = pnand %p974_p5, %p144_p7  ;;  %s156_s24 = sshll.u32 %s1255_s23, 4  ;;  %s157_s24 = int_to_ptr.vmem [resolvable:$true] %s156_s24 }
  0x11   : > { %s1516_s21 = scalar_select %p1328_p6, 1, 0 }
  0x12   : > { %p1010_p9 = pneg %p1333_p8  ;;  %p976_p10 = scmp.ge.s32.totalorder %s1253_s17, 2 }
  0x13   : > { %s34_s26 = sadd.s32 1, %s1249_s16  ;;  %s1094_s27 = scalar_lea.vmem %s157_s24, 32768 }
  0x14   : > { %p1342_p11 = pnand %p1010_p9, %p57_p1  ;;  %p1095_p13 = scmp.ne.s32.totalorder %s157_s24, %s1094_s27 }
  0x15   : > { %p1102_p5 = scmp.lt.s32.totalorder %s157_s24, %s157_s24  ;;  %p1103_p7 = scmp.lt.s32.totalorder %s1094_s27, %s1094_s27 }
  0x16   : > { %p1085_p12 = pneg %p1342_p11 }
  0x17   : > { %p1104_p2 = por %p1103_p7, %p1102_p5 }
  0x18   : > { %p1097_p0 = pnand %p1095_p13, %p1085_p12 }
  0x1a   : > { %p1098_p3 = pneg %p1097_p0 }
  0x1c   : > { %p1105_p6 = pnand %p1104_p2, %p1098_p3 }
  0x1e   : > { %1108 = shalt.err (!%p1105_p6)
}
  0x1f   : > { %s1256_s28 = smov 1024   ;;  %s1257_s29 = smov 64  }
  0x20   : > { %s1519_s2 = sld [smem:[#allocation15_spill]]  ;;  %p36_p2 = scmp.ge.s32.totalorder %s34_s26, 2 }
  0x21   : > { %s43_s5 = sadd.s32 1, %s1241_s14  ;;  %p50_p6 = scmp.ne.s32.totalorder %s1241_s14, %s1237_s13 }
  0x22   : > { %p51_p9 = scmp.eq.s32.totalorder %s1253_s17, 0  ;;  %s1534_s26 = smov (%p36_p2, %s34_s26), 0 }
  0x23   : > { %1520 = sst [smem:[#allocation13_spill]] %s1534_s26  ;;  %p1522_p13 = scmp.eq.s32.totalorder %s1314_s18, 1 }
  0x24   : > { %p1360_p12 = por %p51_p9, %p50_p6  ;;  %s38_s8 = ssub.s32 %s1249_s16, %s1534_s26 }
  0x25   : > { %p1366_p0 = por %p1522_p13, %p50_p6  ;;  %p41_p3 = scmp.eq.s32.totalorder %s38_s8, 0 }
  0x26   : > { %1013 = dma.hbm_to_vmem [thread:$0]  (!%p1342_p11), %s1519_s2, 32768, %s157_s24, [#allocation6], %s1256_s28, %s1256_s28, %s1257_s29  }
  0x27   : > { %p1026_p11 = scmp.lt.s32.totalorder %s1253_s17, 2  ;;  %s1374_s9 = sand.u32 1, %s1241_s14  }
  0x28   : > { %s977_s10 = sshll.u32 %s1374_s9, 3  ;;  %s997_s19 = sshll.u32 %s1249_s16, 7 }
  0x29   : > { %s1378_s11 = scalar_select %p41_p3, %s1241_s14, %s43_s5  }
  0x2a   : > { %s1524_s0 = sld [smem:[#allocation14_spill]]  ;;  %s174_s27 = scalar_lea.vmem [#allocation2], %s977_s10 }
  0x2b   : > { %s184_s28 = sshll.u32 %s174_s27, 4  ;;  %p1386_p5 = pnand %p1026_p11, %p1360_p12  ;;  %s185_s28 = int_to_ptr.vmem [resolvable:$true] %s184_s28 }
  0x2c   : > { %s191_s30 = sand.u32 1, %s1253_s17   ;;  %s980_s4 = sshll.u32 %s1374_s9, 5 }
  0x2d   : > { %s171_s8 = scalar_lea.sflag [#allocation3], %s1374_s9  ;;  %p1111_p7 = pneg %p1386_p5 }
  0x2e   : > { %s1122_s5 = scalar_lea.vmem %s185_s28, 128  ;;  %s1258_s10 = smov [#allocation2]  }
  0x2f   : > { %p1123_p2 = scmp.ne.s32.totalorder %s185_s28, %s1122_s5 }
  0x30   : > { %s182_s25 = scalar_lea.hbm %s1524_s0, %s997_s19  ;;  %s1127_s19 = sshll.u32 %s1258_s10, 4  ;;  %s1128_s19 = int_to_ptr.vmem [resolvable:$false] %s1127_s19 }
  0x31   : > { %p1125_p6 = pnand %p1123_p2, %p1111_p7  ;;  %s1129_s6 = scalar_lea.vmem %s1128_s19, 256 }
  0x32   : > { %p1130_p12 = scmp.lt.s32.totalorder %s185_s28, %s1128_s19  ;;  %p1131_p13 = scmp.lt.s32.totalorder %s1129_s6, %s1122_s5 }
  0x33   : > { %p1126_p9 = pneg %p1125_p6 }
  0x34   : > { %p1132_p11 = por %p1131_p13, %p1130_p12 }
  0x36   : > { %p1133_p3 = pnand %p1132_p11, %p1126_p9 }
  0x38   : > { %1136 = shalt.err (!%p1133_p3)
}
  0x39   : > { %1017 = dma.hbm_to_vmem [thread:$0]  (!%p1386_p5), %s182_s25, 128, %s185_s28, %s171_s8  }
  0x3a   : > { %s998_s9 = sshll.u32 %s1249_s16, 9  ;;  %s195_s0 = scalar_lea.vmem [#allocation5], %s980_s4 }
  0x3b   : > { %s203_s27 = scalar_lea.hbm %s1509_s1, %s998_s9  ;;  %s205_s2 = sshll.u32 %s195_s0, 4  ;;  %s206_s2 = int_to_ptr.vmem [resolvable:$true] %s205_s2 }
  0x3c   : > { %s192_s10 = scalar_lea.sflag [#allocation6], %s191_s30  ;;  %s1150_s26 = scalar_lea.vmem %s206_s2, 512 }
  0x3d   : > { %p1151_p2 = scmp.ne.s32.totalorder %s206_s2, %s1150_s26  ;;  %s1259_s5 = smov [#allocation5]  }
  0x3e   : > { %s1155_s19 = sshll.u32 %s1259_s5, 4  ;;  %s1156_s19 = int_to_ptr.vmem [resolvable:$false] %s1155_s19 }
  0x3f   : > { %p1153_p6 = pnand %p1151_p2, %p1111_p7  ;;  %s1157_s6 = scalar_lea.vmem %s1156_s19, 1024 }
  0x40   : > { %p1158_p12 = scmp.lt.s32.totalorder %s206_s2, %s1156_s19  ;;  %p1159_p13 = scmp.lt.s32.totalorder %s1157_s6, %s1150_s26 }
  0x41   : > { %p1154_p9 = pneg %p1153_p6 }
  0x42   : > { %p1160_p11 = por %p1159_p13, %p1158_p12 }
  0x44   : > { %p1161_p3 = pnand %p1160_p11, %p1154_p9 }
  0x46   : > { %1164 = shalt.err (!%p1161_p3)
}
  0x47   : > { %1020 = dma.hbm_to_vmem [thread:$0]  (!%p1386_p5), %s203_s27, 512, %s206_s2, %s192_s10  }
  0x48   : > { %214 = sbr.rel (%p1333_p8) target bundleno = 426 (0x1aa), region = 32  ;;  %s1412_s0 = sand.u32 (!%p1333_p8), 1, %s1237_s13  }
  0x49   : > { %s984_s25 = sshll.u32 (!%p1333_p8), %s1412_s0, 3  ;;  %s217_s28 = scalar_lea.sflag (!%p1333_p8), [#allocation3], %s1412_s0 }
  0x4a   : > { %s1416_s30 = scalar_lea.vmem (!%p1333_p8), [#allocation2], %s984_s25 }
  0x4d   : > { %1216 = dma.done.wait (%p1323_p4), %s217_s28, 128  }
  0x4e   : > { %1218 = vsyncadd (%p1323_p4), %s217_s28, 4294967168  ;;  %s225_s2 = sand.u32 1, %s1314_s18   ;;  %s985_s22 = sshll.u32 %s1412_s0, 5 }
  0x4f   : > { %s226_s26 = scalar_lea.sflag [#allocation6], %s225_s2  ;;  %s1424_s29 = scalar_lea.vmem [#allocation5], %s985_s22 }
  0x50   : > { %1220 = dma.done.wait (%p1323_p4), %s226_s26, 512  }
  0x51   : > { %1222 = vsyncadd (%p1323_p4), %s226_s26, 4294966784 }
  0x52   : > { %1224 = dma.done.wait (%p57_p1), [#allocation6], 32768  }
  0x53   : > { %1226 = vsyncadd (%p57_p1), [#allocation6], 4294934528  ;;  %v383_v0 = vld [vmem:[#allocation7 + $0x3c8] sm:$0xff]  ;;  %v385_v1 = vld [vmem:[#allocation7 + $0x3d8] sm:$0xff]  ;;  %s987_s18 = sshll.u32 %s1412_s0, 6  ;;  %s999_s8 = sshll.u32 %s1245_s15, 10 }
  0x54   : > { %v382_v2 = vld [vmem:[#allocation7 + $0x3c0] sm:$0xff]  ;;  %521 = vmatprep.subr.mxu0 %v383_v0  ;;  %592 = vmatprep.subr.mxu1 %v385_v1  ;;  %v384_v3 = vld [vmem:[#allocation7 + $0x3d0] sm:$0xff]  ;;  %v375_v4 = vld [vmem:[#allocation7 + $0x388] sm:$0xff]  ;;  %s260_s20 = scalar_lea.vmem [#allocation8], %s987_s18  ;;  %s1460_s24 = scalar_lea.hbm %s1511_s3, %s999_s8 }
  0x55   : > { %v377_v5 = vld [vmem:[#allocation7 + $0x398] sm:$0xff]  ;;  %522 = vmatpush1.msra.mxu0 %v382_v2  ;;  %593 = vmatpush1.msra.mxu1 %v384_v3  ;;  %v374_v6 = vld [vmem:[#allocation7 + $0x380] sm:$0xff]  ;;  %v376_v7 = vld [vmem:[#allocation7 + $0x390] sm:$0xff]  ;;  %s850_s4 = sshll.u32 %s260_s20, 4  ;;  %s835_s27 = scalar_lea.sflag [#allocation4], %s1412_s0  ;;  %s1455_s4 = int_to_ptr.vmem [resolvable:$true] %s850_s4 }
  0x56   : > { %v367_v8 = vld [vmem:[#allocation7 + $0x348] sm:$0xff]  ;;  %523 = vmatprep.subr.mxu0 %v375_v4  ;;  %594 = vmatprep.subr.mxu1 %v377_v5  ;;  %v369_v9 = vld [vmem:[#allocation7 + $0x358] sm:$0xff]  ;;  %v366_v10 = vld [vmem:[#allocation7 + $0x340] sm:$0xff]  ;;  %s1165_s15 = scalar_lea.vmem %s1455_s4, 1024  ;;  %s1260_s10 = smov [#allocation8]  }
  0x57   : > { %v368_v11 = vld [vmem:[#allocation7 + $0x350] sm:$0xff]  ;;  %524 = vmatpush1.msra.mxu0 %v374_v6  ;;  %595 = vmatpush1.msra.mxu1 %v376_v7  ;;  %v359_v12 = vld [vmem:[#allocation7 + $0x308] sm:$0xff]  ;;  %v361_v13 = vld [vmem:[#allocation7 + $0x318] sm:$0xff]  ;;  %p1166_p1 = scmp.ne.s32.totalorder %s1455_s4, %s1165_s15  ;;  %s1169_s5 = sshll.u32 %s1260_s10, 4  ;;  %s1170_s5 = int_to_ptr.vmem [resolvable:$false] %s1169_s5 }
  0x58   : > { %525 = vmatprep.subr.mxu0 %v367_v8  ;;  %596 = vmatprep.subr.mxu1 %v369_v9  ;;  %v358_v14 = vld [vmem:[#allocation7 + $0x300] sm:$0xff]  ;;  %v360_v15 = vld [vmem:[#allocation7 + $0x310] sm:$0xff]  ;;  %v351_v16 = vld [vmem:[#allocation7 + $0x2c8] sm:$0xff]  ;;  %s1171_s19 = scalar_lea.vmem %s1170_s5, 2048  ;;  %p1172_p5 = scmp.lt.s32.totalorder %s1455_s4, %s1170_s5 }
  0x59   : > { %526 = vmatpush1.msra.mxu0 %v366_v10  ;;  %597 = vmatpush1.msra.mxu1 %v368_v11  ;;  %v353_v17 = vld [vmem:[#allocation7 + $0x2d8] sm:$0xff]  ;;  %v350_v18 = vld [vmem:[#allocation7 + $0x2c0] sm:$0xff]  ;;  %v352_v19 = vld [vmem:[#allocation7 + $0x2d0] sm:$0xff]  ;;  %p1167_p4 = pnand %p1166_p1, %p1366_p0  ;;  %p1173_p7 = scmp.lt.s32.totalorder %s1171_s19, %s1165_s15 }
  0x5a   : > { %527 = vmatprep.subr.mxu0 %v359_v12  ;;  %598 = vmatprep.subr.mxu1 %v361_v13  ;;  %v343_v20 = vld [vmem:[#allocation7 + $0x288] sm:$0xff]  ;;  %v345_v21 = vld [vmem:[#allocation7 + $0x298] sm:$0xff]  ;;  %v342_v22 = vld [vmem:[#allocation7 + $0x280] sm:$0xff] }
  0x5b   : > { %528 = vmatpush1.msra.mxu0 %v358_v14  ;;  %599 = vmatpush1.msra.mxu1 %v360_v15  ;;  %v344_v23 = vld [vmem:[#allocation7 + $0x290] sm:$0xff]  ;;  %v335_v24 = vld [vmem:[#allocation7 + $0x248] sm:$0xff]  ;;  %v337_v25 = vld [vmem:[#allocation7 + $0x258] sm:$0xff]  ;;  %p1168_p8 = pneg %p1167_p4  ;;  %p1174_p2 = por %p1173_p7, %p1172_p5 }
  0x5c   : > { %529 = vmatprep.subr.mxu0 %v351_v16  ;;  %600 = vmatprep.subr.mxu1 %v353_v17  ;;  %v334_v26 = vld [vmem:[#allocation7 + $0x240] sm:$0xff]  ;;  %v336_v27 = vld [vmem:[#allocation7 + $0x250] sm:$0xff]  ;;  %v327_v28 = vld [vmem:[#allocation7 + $0x208] sm:$0xff] }
  0x5d   : > { %530 = vmatpush1.msra.mxu0 %v350_v18  ;;  %601 = vmatpush1.msra.mxu1 %v352_v19  ;;  %v329_v29 = vld [vmem:[#allocation7 + $0x218] sm:$0xff]  ;;  %v326_v30 = vld [vmem:[#allocation7 + $0x200] sm:$0xff]  ;;  %v328_v31 = vld [vmem:[#allocation7 + $0x210] sm:$0xff]  ;;  %p1175_p6 = pnand %p1174_p2, %p1168_p8 }
  0x5e   : > { %531 = vmatprep.subr.mxu0 %v343_v20  ;;  %602 = vmatprep.subr.mxu1 %v345_v21  ;;  %v319_v32 = vld [vmem:[#allocation7 + $0x1c8] sm:$0xff]  ;;  %v321_v33 = vld [vmem:[#allocation7 + $0x1d8] sm:$0xff]  ;;  %v318_v34 = vld [vmem:[#allocation7 + $0x1c0] sm:$0xff] }
  0x5f   : > { %532 = vmatpush1.msra.mxu0 %v342_v22  ;;  %603 = vmatpush1.msra.mxu1 %v344_v23  ;;  %v320_v35 = vld [vmem:[#allocation7 + $0x1d0] sm:$0xff]  ;;  %v311_v36 = vld [vmem:[#allocation7 + $0x188] sm:$0xff]  ;;  %v313_v37 = vld [vmem:[#allocation7 + $0x198] sm:$0xff] }
  0x60   : > { %533 = vmatprep.subr.mxu0 %v335_v24  ;;  %604 = vmatprep.subr.mxu1 %v337_v25  ;;  %v310_v38 = vld [vmem:[#allocation7 + $0x180] sm:$0xff]  ;;  %v312_v39 = vld [vmem:[#allocation7 + $0x190] sm:$0xff]  ;;  %v303_v40 = vld [vmem:[#allocation7 + $0x148] sm:$0xff] }
  0x61   : > { %534 = vmatpush1.msra.mxu0 %v334_v26  ;;  %605 = vmatpush1.msra.mxu1 %v336_v27  ;;  %v305_v41 = vld [vmem:[#allocation7 + $0x158] sm:$0xff]  ;;  %v302_v42 = vld [vmem:[#allocation7 + $0x140] sm:$0xff]  ;;  %v304_v43 = vld [vmem:[#allocation7 + $0x150] sm:$0xff] }
  0x62   : > { %535 = vmatprep.subr.mxu0 %v327_v28  ;;  %606 = vmatprep.subr.mxu1 %v329_v29  ;;  %v295_v44 = vld [vmem:[#allocation7 + $0x108] sm:$0xff]  ;;  %v297_v45 = vld [vmem:[#allocation7 + $0x118] sm:$0xff]  ;;  %v294_v46 = vld [vmem:[#allocation7 + $0x100] sm:$0xff] }
  0x63   : > { %536 = vmatpush1.msra.mxu0 %v326_v30  ;;  %607 = vmatpush1.msra.mxu1 %v328_v31  ;;  %v296_v47 = vld [vmem:[#allocation7 + $0x110] sm:$0xff]  ;;  %v287_v48 = vld [vmem:[#allocation7 + $0xc8] sm:$0xff]  ;;  %v289_v49 = vld [vmem:[#allocation7 + $0xd8] sm:$0xff] }
  0x64   : > { %537 = vmatprep.subr.mxu0 %v319_v32  ;;  %608 = vmatprep.subr.mxu1 %v321_v33  ;;  %v286_v50 = vld [vmem:[#allocation7 + $0xc0] sm:$0xff]  ;;  %v288_v51 = vld [vmem:[#allocation7 + $0xd0] sm:$0xff]  ;;  %v279_v52 = vld [vmem:[#allocation7 + $0x88] sm:$0xff] }
  0x65   : > { %538 = vmatpush1.msra.mxu0 %v318_v34  ;;  %609 = vmatpush1.msra.mxu1 %v320_v35  ;;  %v281_v53 = vld [vmem:[#allocation7 + $0x98] sm:$0xff]  ;;  %v278_v54 = vld [vmem:[#allocation7 + $0x80] sm:$0xff]  ;;  %v280_v55 = vld [vmem:[#allocation7 + $0x90] sm:$0xff] }
  0x66   : > { %539 = vmatprep.subr.mxu0 %v311_v36  ;;  %610 = vmatprep.subr.mxu1 %v313_v37  ;;  %v271_v56 = vld [vmem:[#allocation7 + $0x48] sm:$0xff]  ;;  %v273_v57 = vld [vmem:[#allocation7 + $0x58] sm:$0xff]  ;;  %v270_v58 = vld [vmem:[#allocation7 + $0x40] sm:$0xff] }
  0x67   : > { %540 = vmatpush1.msra.mxu0 %v310_v38  ;;  %611 = vmatpush1.msra.mxu1 %v312_v39  ;;  %v272_v59 = vld [vmem:[#allocation7 + $0x50] sm:$0xff]  ;;  %v263_v60 = vld [vmem:[#allocation7 + $0x8] sm:$0xff]  ;;  %v265_v61 = vld [vmem:[#allocation7 + $0x18] sm:$0xff] }
  0x68   : > { %541 = vmatprep.subr.mxu0 %v303_v40  ;;  %612 = vmatprep.subr.mxu1 %v305_v41  ;;  %v262_v62 = vld [vmem:[#allocation7] sm:$0xff]  ;;  %v264_v63 = vld [vmem:[#allocation7 + $0x10] sm:$0xff]  ;;  %v511_v0 = vld [vmem:[#allocation7 + $0x7c8] sm:$0xff] }
  0x69   : > { %542 = vmatpush1.msra.mxu0 %v302_v42  ;;  %613 = vmatpush1.msra.mxu1 %v304_v43  ;;  %v513_v1 = vld [vmem:[#allocation7 + $0x7d8] sm:$0xff]  ;;  %v510_v2 = vld [vmem:[#allocation7 + $0x7c0] sm:$0xff]  ;;  %v512_v3 = vld [vmem:[#allocation7 + $0x7d0] sm:$0xff] }
  0x6a   : > { %543 = vmatprep.subr.mxu0 %v295_v44  ;;  %614 = vmatprep.subr.mxu1 %v297_v45  ;;  %v503_v4 = vld [vmem:[#allocation7 + $0x788] sm:$0xff]  ;;  %v505_v5 = vld [vmem:[#allocation7 + $0x798] sm:$0xff]  ;;  %v502_v6 = vld [vmem:[#allocation7 + $0x780] sm:$0xff] }
  0x6b   : > { %544 = vmatpush1.msra.mxu0 %v294_v46  ;;  %615 = vmatpush1.msra.mxu1 %v296_v47  ;;  %v504_v7 = vld [vmem:[#allocation7 + $0x790] sm:$0xff]  ;;  %v495_v8 = vld [vmem:[#allocation7 + $0x748] sm:$0xff]  ;;  %v497_v9 = vld [vmem:[#allocation7 + $0x758] sm:$0xff] }
  0x6c   : > { %545 = vmatprep.subr.mxu0 %v287_v48  ;;  %616 = vmatprep.subr.mxu1 %v289_v49  ;;  %v494_v10 = vld [vmem:[#allocation7 + $0x740] sm:$0xff]  ;;  %v496_v11 = vld [vmem:[#allocation7 + $0x750] sm:$0xff]  ;;  %v487_v12 = vld [vmem:[#allocation7 + $0x708] sm:$0xff] }
  0x6d   : > { %546 = vmatpush1.msra.mxu0 %v286_v50  ;;  %617 = vmatpush1.msra.mxu1 %v288_v51  ;;  %v489_v13 = vld [vmem:[#allocation7 + $0x718] sm:$0xff]  ;;  %v486_v14 = vld [vmem:[#allocation7 + $0x700] sm:$0xff]  ;;  %v488_v15 = vld [vmem:[#allocation7 + $0x710] sm:$0xff] }
  0x6e   : > { %547 = vmatprep.subr.mxu0 %v279_v52  ;;  %618 = vmatprep.subr.mxu1 %v281_v53  ;;  %v479_v16 = vld [vmem:[#allocation7 + $0x6c8] sm:$0xff]  ;;  %v481_v17 = vld [vmem:[#allocation7 + $0x6d8] sm:$0xff]  ;;  %v478_v18 = vld [vmem:[#allocation7 + $0x6c0] sm:$0xff] }
  0x6f   : > { %548 = vmatpush1.msra.mxu0 %v278_v54  ;;  %619 = vmatpush1.msra.mxu1 %v280_v55  ;;  %v480_v19 = vld [vmem:[#allocation7 + $0x6d0] sm:$0xff]  ;;  %v471_v20 = vld [vmem:[#allocation7 + $0x688] sm:$0xff]  ;;  %v473_v21 = vld [vmem:[#allocation7 + $0x698] sm:$0xff] }
  0x70   : > { %549 = vmatprep.subr.mxu0 %v271_v56  ;;  %620 = vmatprep.subr.mxu1 %v273_v57  ;;  %v470_v22 = vld [vmem:[#allocation7 + $0x680] sm:$0xff]  ;;  %v472_v23 = vld [vmem:[#allocation7 + $0x690] sm:$0xff]  ;;  %v463_v24 = vld [vmem:[#allocation7 + $0x648] sm:$0xff] }
  0x71   : > { %550 = vmatpush1.msra.mxu0 %v270_v58  ;;  %621 = vmatpush1.msra.mxu1 %v272_v59  ;;  %v465_v25 = vld [vmem:[#allocation7 + $0x658] sm:$0xff]  ;;  %v462_v26 = vld [vmem:[#allocation7 + $0x640] sm:$0xff]  ;;  %v464_v27 = vld [vmem:[#allocation7 + $0x650] sm:$0xff] }
  0x72   : > { %551 = vmatprep.subr.mxu0 %v263_v60  ;;  %622 = vmatprep.subr.mxu1 %v265_v61  ;;  %v455_v28 = vld [vmem:[#allocation7 + $0x608] sm:$0xff]  ;;  %v457_v29 = vld [vmem:[#allocation7 + $0x618] sm:$0xff]  ;;  %v454_v30 = vld [vmem:[#allocation7 + $0x600] sm:$0xff] }
  0x73   : > { %552 = vmatpush1.msra.mxu0 %v262_v62  ;;  %623 = vmatpush1.msra.mxu1 %v264_v63  ;;  %v456_v31 = vld [vmem:[#allocation7 + $0x610] sm:$0xff]  ;;  %v447_v32 = vld [vmem:[#allocation7 + $0x5c8] sm:$0xff]  ;;  %v449_v33 = vld [vmem:[#allocation7 + $0x5d8] sm:$0xff] }
  0x74   : > { %553 = vmatprep.subr.mxu0 %v511_v0  ;;  %624 = vmatprep.subr.mxu1 %v513_v1  ;;  %v446_v34 = vld [vmem:[#allocation7 + $0x5c0] sm:$0xff]  ;;  %v448_v35 = vld [vmem:[#allocation7 + $0x5d0] sm:$0xff]  ;;  %v439_v36 = vld [vmem:[#allocation7 + $0x588] sm:$0xff] }
  0x75   : > { %554 = vmatpush2.msra.mxu0 %v510_v2  ;;  %625 = vmatpush2.msra.mxu1 %v512_v3  ;;  %v441_v37 = vld [vmem:[#allocation7 + $0x598] sm:$0xff]  ;;  %v438_v38 = vld [vmem:[#allocation7 + $0x580] sm:$0xff]  ;;  %v440_v39 = vld [vmem:[#allocation7 + $0x590] sm:$0xff] }
  0x76   : > { %555 = vmatprep.subr.mxu0 %v503_v4  ;;  %626 = vmatprep.subr.mxu1 %v505_v5  ;;  %v431_v40 = vld [vmem:[#allocation7 + $0x548] sm:$0xff]  ;;  %v433_v41 = vld [vmem:[#allocation7 + $0x558] sm:$0xff]  ;;  %v430_v42 = vld [vmem:[#allocation7 + $0x540] sm:$0xff] }
  0x77   : > { %556 = vmatpush2.msra.mxu0 %v502_v6  ;;  %627 = vmatpush2.msra.mxu1 %v504_v7  ;;  %v432_v43 = vld [vmem:[#allocation7 + $0x550] sm:$0xff]  ;;  %v423_v44 = vld [vmem:[#allocation7 + $0x508] sm:$0xff]  ;;  %v425_v45 = vld [vmem:[#allocation7 + $0x518] sm:$0xff] }
  0x78   : > { %557 = vmatprep.subr.mxu0 %v495_v8  ;;  %628 = vmatprep.subr.mxu1 %v497_v9  ;;  %v422_v46 = vld [vmem:[#allocation7 + $0x500] sm:$0xff]  ;;  %v424_v47 = vld [vmem:[#allocation7 + $0x510] sm:$0xff]  ;;  %v415_v48 = vld [vmem:[#allocation7 + $0x4c8] sm:$0xff] }
  0x79   : > { %558 = vmatpush2.msra.mxu0 %v494_v10  ;;  %629 = vmatpush2.msra.mxu1 %v496_v11  ;;  %v417_v49 = vld [vmem:[#allocation7 + $0x4d8] sm:$0xff]  ;;  %v414_v50 = vld [vmem:[#allocation7 + $0x4c0] sm:$0xff]  ;;  %v416_v51 = vld [vmem:[#allocation7 + $0x4d0] sm:$0xff] }
  0x7a   : > { %559 = vmatprep.subr.mxu0 %v487_v12  ;;  %630 = vmatprep.subr.mxu1 %v489_v13  ;;  %v407_v52 = vld [vmem:[#allocation7 + $0x488] sm:$0xff]  ;;  %v409_v53 = vld [vmem:[#allocation7 + $0x498] sm:$0xff]  ;;  %v406_v54 = vld [vmem:[#allocation7 + $0x480] sm:$0xff] }
  0x7b   : > { %560 = vmatpush2.msra.mxu0 %v486_v14  ;;  %631 = vmatpush2.msra.mxu1 %v488_v15  ;;  %v408_v55 = vld [vmem:[#allocation7 + $0x490] sm:$0xff]  ;;  %v399_v57 = vld [vmem:[#allocation7 + $0x448] sm:$0xff]  ;;  %v401_v58 = vld [vmem:[#allocation7 + $0x458] sm:$0xff] }
  0x7c   : > { %561 = vmatprep.subr.mxu0 %v479_v16  ;;  %632 = vmatprep.subr.mxu1 %v481_v17  ;;  %v1435_v56 = vld [vmem:[%s1416_s30] sm:$0xff]  ;;  %v398_v59 = vld [vmem:[#allocation7 + $0x440] sm:$0xff]  ;;  %v391_v61 = vld [vmem:[#allocation7 + $0x408] sm:$0xff] }
  0x7d   : > { %562 = vmatpush2.msra.mxu0 %v478_v18  ;;  %633 = vmatpush2.msra.mxu1 %v480_v19  ;;  %v400_v60 = vld [vmem:[#allocation7 + $0x450] sm:$0xff]  ;;  %v393_v62 = vld [vmem:[#allocation7 + $0x418] sm:$0xff]  ;;  %v1439_v63 = vcombine.high %v1435_v56, %v1435_v56  ;;  %v390_v0 = vld [vmem:[#allocation7 + $0x400] sm:$0xff] }
  0x7e   : > { %563 = vmatprep.subr.mxu0 %v471_v20  ;;  %634 = vmatprep.subr.mxu1 %v473_v21  ;;  %v392_v1 = vld [vmem:[#allocation7 + $0x410] sm:$0xff]  ;;  %v387_v2 = vld [vmem:[#allocation7 + $0x3e8] sm:$0xff]  ;;  %v389_v3 = vld [vmem:[#allocation7 + $0x3f8] sm:$0xff] }
  0x7f   : > { %564 = vmatpush2.msra.mxu0 %v470_v22  ;;  %635 = vmatpush2.msra.mxu1 %v472_v23  ;;  %v386_v4 = vld [vmem:[#allocation7 + $0x3e0] sm:$0xff]  ;;  %v388_v5 = vld [vmem:[#allocation7 + $0x3f0] sm:$0xff]  ;;  %v379_v6 = vld [vmem:[#allocation7 + $0x3a8] sm:$0xff] }
  0x80   : > { %565 = vmatprep.subr.mxu0 %v463_v24  ;;  %636 = vmatprep.subr.mxu1 %v465_v25  ;;  %v381_v7 = vld [vmem:[#allocation7 + $0x3b8] sm:$0xff]  ;;  %v378_v8 = vld [vmem:[#allocation7 + $0x3a0] sm:$0xff]  ;;  %v380_v9 = vld [vmem:[#allocation7 + $0x3b0] sm:$0xff] }
  0x81   : > { %566 = vmatpush2.msra.mxu0 %v462_v26  ;;  %637 = vmatpush2.msra.mxu1 %v464_v27  ;;  %v371_v10 = vld [vmem:[#allocation7 + $0x368] sm:$0xff]  ;;  %v373_v11 = vld [vmem:[#allocation7 + $0x378] sm:$0xff]  ;;  %v370_v12 = vld [vmem:[#allocation7 + $0x360] sm:$0xff] }
  0x82   : > { %567 = vmatprep.subr.mxu0 %v455_v28  ;;  %638 = vmatprep.subr.mxu1 %v457_v29  ;;  %v372_v13 = vld [vmem:[#allocation7 + $0x370] sm:$0xff]  ;;  %v363_v14 = vld [vmem:[#allocation7 + $0x328] sm:$0xff]  ;;  %v365_v15 = vld [vmem:[#allocation7 + $0x338] sm:$0xff] }
  0x83   : > { %568 = vmatpush2.msra.mxu0 %v454_v30  ;;  %639 = vmatpush2.msra.mxu1 %v456_v31  ;;  %v362_v16 = vld [vmem:[#allocation7 + $0x320] sm:$0xff]  ;;  %v364_v17 = vld [vmem:[#allocation7 + $0x330] sm:$0xff]  ;;  %v355_v18 = vld [vmem:[#allocation7 + $0x2e8] sm:$0xff] }
  0x84   : > { %569 = vmatprep.subr.mxu0 %v447_v32  ;;  %640 = vmatprep.subr.mxu1 %v449_v33  ;;  %v357_v19 = vld [vmem:[#allocation7 + $0x2f8] sm:$0xff]  ;;  %v354_v20 = vld [vmem:[#allocation7 + $0x2e0] sm:$0xff]  ;;  %v356_v21 = vld [vmem:[#allocation7 + $0x2f0] sm:$0xff] }
  0x85   : > { %570 = vmatpush2.msra.mxu0 %v446_v34  ;;  %641 = vmatpush2.msra.mxu1 %v448_v35  ;;  %v347_v22 = vld [vmem:[#allocation7 + $0x2a8] sm:$0xff]  ;;  %v349_v23 = vld [vmem:[#allocation7 + $0x2b8] sm:$0xff]  ;;  %v346_v24 = vld [vmem:[#allocation7 + $0x2a0] sm:$0xff] }
  0x86   : > { %571 = vmatprep.subr.mxu0 %v439_v36  ;;  %642 = vmatprep.subr.mxu1 %v441_v37  ;;  %v348_v25 = vld [vmem:[#allocation7 + $0x2b0] sm:$0xff]  ;;  %v339_v26 = vld [vmem:[#allocation7 + $0x268] sm:$0xff]  ;;  %v341_v27 = vld [vmem:[#allocation7 + $0x278] sm:$0xff] }
  0x87   : > { %572 = vmatpush2.msra.mxu0 %v438_v38  ;;  %643 = vmatpush2.msra.mxu1 %v440_v39  ;;  %v338_v28 = vld [vmem:[#allocation7 + $0x260] sm:$0xff]  ;;  %v340_v29 = vld [vmem:[#allocation7 + $0x270] sm:$0xff]  ;;  %v331_v30 = vld [vmem:[#allocation7 + $0x228] sm:$0xff] }
  0x88   : > { %573 = vmatprep.subr.mxu0 %v431_v40  ;;  %644 = vmatprep.subr.mxu1 %v433_v41  ;;  %v333_v31 = vld [vmem:[#allocation7 + $0x238] sm:$0xff]  ;;  %v330_v32 = vld [vmem:[#allocation7 + $0x220] sm:$0xff]  ;;  %v332_v33 = vld [vmem:[#allocation7 + $0x230] sm:$0xff] }
  0x89   : > { %574 = vmatpush2.msra.mxu0 %v430_v42  ;;  %645 = vmatpush2.msra.mxu1 %v432_v43  ;;  %v323_v34 = vld [vmem:[#allocation7 + $0x1e8] sm:$0xff]  ;;  %v325_v35 = vld [vmem:[#allocation7 + $0x1f8] sm:$0xff]  ;;  %v322_v36 = vld [vmem:[#allocation7 + $0x1e0] sm:$0xff] }
  0x8a   : > { %575 = vmatprep.subr.mxu0 %v423_v44  ;;  %646 = vmatprep.subr.mxu1 %v425_v45  ;;  %v324_v37 = vld [vmem:[#allocation7 + $0x1f0] sm:$0xff]  ;;  %v315_v38 = vld [vmem:[#allocation7 + $0x1a8] sm:$0xff]  ;;  %v317_v39 = vld [vmem:[#allocation7 + $0x1b8] sm:$0xff] }
  0x8b   : > { %576 = vmatpush2.msra.mxu0 %v422_v46  ;;  %647 = vmatpush2.msra.mxu1 %v424_v47  ;;  %v314_v40 = vld [vmem:[#allocation7 + $0x1a0] sm:$0xff]  ;;  %v316_v41 = vld [vmem:[#allocation7 + $0x1b0] sm:$0xff]  ;;  %v307_v42 = vld [vmem:[#allocation7 + $0x168] sm:$0xff] }
  0x8c   : > { %577 = vmatprep.subr.mxu0 %v415_v48  ;;  %648 = vmatprep.subr.mxu1 %v417_v49  ;;  %v309_v43 = vld [vmem:[#allocation7 + $0x178] sm:$0xff]  ;;  %v306_v44 = vld [vmem:[#allocation7 + $0x160] sm:$0xff]  ;;  %v308_v45 = vld [vmem:[#allocation7 + $0x170] sm:$0xff] }
  0x8d   : > { %578 = vmatpush2.msra.mxu0 %v414_v50  ;;  %649 = vmatpush2.msra.mxu1 %v416_v51  ;;  %v299_v46 = vld [vmem:[#allocation7 + $0x128] sm:$0xff]  ;;  %v301_v47 = vld [vmem:[#allocation7 + $0x138] sm:$0xff]  ;;  %v298_v48 = vld [vmem:[#allocation7 + $0x120] sm:$0xff] }
  0x8e   : > { %579 = vmatprep.subr.mxu0 %v407_v52  ;;  %650 = vmatprep.subr.mxu1 %v409_v53  ;;  %v300_v49 = vld [vmem:[#allocation7 + $0x130] sm:$0xff]  ;;  %v291_v50 = vld [vmem:[#allocation7 + $0xe8] sm:$0xff]  ;;  %v293_v51 = vld [vmem:[#allocation7 + $0xf8] sm:$0xff] }
  0x8f   : > { %580 = vmatpush2.msra.mxu0 %v406_v54  ;;  %651 = vmatpush2.msra.mxu1 %v408_v55  ;;  %v290_v52 = vld [vmem:[#allocation7 + $0xe0] sm:$0xff]  ;;  %v292_v53 = vld [vmem:[#allocation7 + $0xf0] sm:$0xff]  ;;  %v283_v54 = vld [vmem:[#allocation7 + $0xa8] sm:$0xff] }
  0x90   : > { %581 = vmatprep.subr.mxu0 %v399_v57  ;;  %652 = vmatprep.subr.mxu1 %v401_v58  ;;  %v285_v55 = vld [vmem:[#allocation7 + $0xb8] sm:$0xff]  ;;  %v282_v57 = vld [vmem:[#allocation7 + $0xa0] sm:$0xff]  ;;  %v284_v58 = vld [vmem:[#allocation7 + $0xb0] sm:$0xff] }
  0x91   : > { %582 = vmatpush2.msra.mxu0 %v398_v59  ;;  %653 = vmatpush2.msra.mxu1 %v400_v60  ;;  %v275_v59 = vld [vmem:[#allocation7 + $0x68] sm:$0xff]  ;;  %v277_v60 = vld [vmem:[#allocation7 + $0x78] sm:$0xff] }
  0x92   : > { %583 = vmatprep.subr.mxu0 %v391_v61  ;;  %654 = vmatprep.subr.mxu1 %v393_v62  ;;  %v274_v61 = vld [vmem:[#allocation7 + $0x60] sm:$0xff]  ;;  %v276_v62 = vld [vmem:[#allocation7 + $0x70] sm:$0xff] }
  0x93   : > { %584 = vmatpush2.msra.mxu0 %v390_v0  ;;  %585 = vmatprep.mubr.f32.mxu0 %v1439_v63  ;;  %v267_v0 = vld [vmem:[#allocation7 + $0x28] sm:$0xff] }
  0x94   : > { %655 = vmatpush2.msra.mxu1 %v392_v1  ;;  %656 = vmatprep.mubr.f32.mxu1 %v1439_v63  ;;  %v269_v1 = vld [vmem:[#allocation7 + $0x38] sm:$0xff] }
  0x95   : > { %586 = vmatmul.mubr.f32.vlgmr.msra.gmra.mxu0 %v1435_v56  ;;  %657 = vmatmul.mubr.f32.vlgmr.msra.gmra.mxu1 %v1435_v56 }
  0x96   : > { %663 = vmatprep.subr.mxu0 %v387_v2  ;;  %734 = vmatprep.subr.mxu1 %v389_v3  ;;  %v266_v2 = vld [vmem:[#allocation7 + $0x20] sm:$0xff]  ;;  %v268_v3 = vld [vmem:[#allocation7 + $0x30] sm:$0xff] }
  0x97   : > { %664 = vmatpush1.msra.mxu0 %v386_v4  ;;  %735 = vmatpush1.msra.mxu1 %v388_v5  ;;  %v515_v4 = vld [vmem:[#allocation7 + $0x7e8] sm:$0xff]  ;;  %v517_v5 = vld [vmem:[#allocation7 + $0x7f8] sm:$0xff] }
  0x98   : > { %665 = vmatprep.subr.mxu0 %v379_v6  ;;  %736 = vmatprep.subr.mxu1 %v381_v7  ;;  %v514_v6 = vld [vmem:[#allocation7 + $0x7e0] sm:$0xff]  ;;  %v516_v7 = vld [vmem:[#allocation7 + $0x7f0] sm:$0xff] }
  0x99   : > { %666 = vmatpush1.msra.mxu0 %v378_v8  ;;  %737 = vmatpush1.msra.mxu1 %v380_v9  ;;  %v507_v8 = vld [vmem:[#allocation7 + $0x7a8] sm:$0xff]  ;;  %v509_v9 = vld [vmem:[#allocation7 + $0x7b8] sm:$0xff] }
  0x9a   : > { %667 = vmatprep.subr.mxu0 %v371_v10  ;;  %738 = vmatprep.subr.mxu1 %v373_v11  ;;  %v506_v10 = vld [vmem:[#allocation7 + $0x7a0] sm:$0xff]  ;;  %v508_v11 = vld [vmem:[#allocation7 + $0x7b0] sm:$0xff] }
  0x9b   : > { %668 = vmatpush1.msra.mxu0 %v370_v12  ;;  %739 = vmatpush1.msra.mxu1 %v372_v13  ;;  %v499_v12 = vld [vmem:[#allocation7 + $0x768] sm:$0xff]  ;;  %v501_v13 = vld [vmem:[#allocation7 + $0x778] sm:$0xff] }
  0x9c   : > { %669 = vmatprep.subr.mxu0 %v363_v14  ;;  %740 = vmatprep.subr.mxu1 %v365_v15  ;;  %v498_v14 = vld [vmem:[#allocation7 + $0x760] sm:$0xff]  ;;  %v500_v15 = vld [vmem:[#allocation7 + $0x770] sm:$0xff] }
  0x9d   : > { %670 = vmatpush1.msra.mxu0 %v362_v16  ;;  %741 = vmatpush1.msra.mxu1 %v364_v17  ;;  %v491_v16 = vld [vmem:[#allocation7 + $0x728] sm:$0xff]  ;;  %v493_v17 = vld [vmem:[#allocation7 + $0x738] sm:$0xff] }
  0x9e   : > { %671 = vmatprep.subr.mxu0 %v355_v18  ;;  %742 = vmatprep.subr.mxu1 %v357_v19  ;;  %v490_v18 = vld [vmem:[#allocation7 + $0x720] sm:$0xff]  ;;  %v492_v19 = vld [vmem:[#allocation7 + $0x730] sm:$0xff] }
  0x9f   : > { %672 = vmatpush1.msra.mxu0 %v354_v20  ;;  %743 = vmatpush1.msra.mxu1 %v356_v21  ;;  %v483_v20 = vld [vmem:[#allocation7 + $0x6e8] sm:$0xff]  ;;  %v485_v21 = vld [vmem:[#allocation7 + $0x6f8] sm:$0xff] }
  0xa0   : > { %673 = vmatprep.subr.mxu0 %v347_v22  ;;  %744 = vmatprep.subr.mxu1 %v349_v23  ;;  %v482_v22 = vld [vmem:[#allocation7 + $0x6e0] sm:$0xff]  ;;  %v484_v23 = vld [vmem:[#allocation7 + $0x6f0] sm:$0xff] }
  0xa1   : > { %674 = vmatpush1.msra.mxu0 %v346_v24  ;;  %745 = vmatpush1.msra.mxu1 %v348_v25  ;;  %v475_v24 = vld [vmem:[#allocation7 + $0x6a8] sm:$0xff]  ;;  %v477_v25 = vld [vmem:[#allocation7 + $0x6b8] sm:$0xff] }
  0xa2   : > { %675 = vmatprep.subr.mxu0 %v339_v26  ;;  %746 = vmatprep.subr.mxu1 %v341_v27  ;;  %v474_v26 = vld [vmem:[#allocation7 + $0x6a0] sm:$0xff]  ;;  %v476_v27 = vld [vmem:[#allocation7 + $0x6b0] sm:$0xff] }
  0xa3   : > { %676 = vmatpush1.msra.mxu0 %v338_v28  ;;  %747 = vmatpush1.msra.mxu1 %v340_v29  ;;  %v467_v28 = vld [vmem:[#allocation7 + $0x668] sm:$0xff]  ;;  %v469_v29 = vld [vmem:[#allocation7 + $0x678] sm:$0xff] }
  0xa4   : > { %677 = vmatprep.subr.mxu0 %v331_v30  ;;  %748 = vmatprep.subr.mxu1 %v333_v31  ;;  %v466_v30 = vld [vmem:[#allocation7 + $0x660] sm:$0xff]  ;;  %v468_v31 = vld [vmem:[#allocation7 + $0x670] sm:$0xff] }
  0xa5   : > { %678 = vmatpush1.msra.mxu0 %v330_v32  ;;  %749 = vmatpush1.msra.mxu1 %v332_v33  ;;  %v459_v32 = vld [vmem:[#allocation7 + $0x628] sm:$0xff]  ;;  %v461_v33 = vld [vmem:[#allocation7 + $0x638] sm:$0xff] }
  0xa6   : > { %679 = vmatprep.subr.mxu0 %v323_v34  ;;  %750 = vmatprep.subr.mxu1 %v325_v35  ;;  %v458_v34 = vld [vmem:[#allocation7 + $0x620] sm:$0xff]  ;;  %v460_v35 = vld [vmem:[#allocation7 + $0x630] sm:$0xff] }
  0xa7   : > { %680 = vmatpush1.msra.mxu0 %v322_v36  ;;  %751 = vmatpush1.msra.mxu1 %v324_v37  ;;  %v451_v36 = vld [vmem:[#allocation7 + $0x5e8] sm:$0xff]  ;;  %v453_v37 = vld [vmem:[#allocation7 + $0x5f8] sm:$0xff] }
  0xa8   : > { %681 = vmatprep.subr.mxu0 %v315_v38  ;;  %752 = vmatprep.subr.mxu1 %v317_v39  ;;  %v450_v38 = vld [vmem:[#allocation7 + $0x5e0] sm:$0xff]  ;;  %v452_v39 = vld [vmem:[#allocation7 + $0x5f0] sm:$0xff] }
  0xa9   : > { %682 = vmatpush1.msra.mxu0 %v314_v40  ;;  %753 = vmatpush1.msra.mxu1 %v316_v41  ;;  %v443_v40 = vld [vmem:[#allocation7 + $0x5a8] sm:$0xff]  ;;  %v445_v41 = vld [vmem:[#allocation7 + $0x5b8] sm:$0xff] }
  0xaa   : > { %683 = vmatprep.subr.mxu0 %v307_v42  ;;  %754 = vmatprep.subr.mxu1 %v309_v43  ;;  %v442_v42 = vld [vmem:[#allocation7 + $0x5a0] sm:$0xff]  ;;  %v444_v43 = vld [vmem:[#allocation7 + $0x5b0] sm:$0xff] }
  0xab   : > { %684 = vmatpush1.msra.mxu0 %v306_v44  ;;  %755 = vmatpush1.msra.mxu1 %v308_v45  ;;  %v435_v44 = vld [vmem:[#allocation7 + $0x568] sm:$0xff]  ;;  %v437_v45 = vld [vmem:[#allocation7 + $0x578] sm:$0xff] }
  0xac   : > { %685 = vmatprep.subr.mxu0 %v299_v46  ;;  %756 = vmatprep.subr.mxu1 %v301_v47  ;;  %v434_v46 = vld [vmem:[#allocation7 + $0x560] sm:$0xff]  ;;  %v436_v47 = vld [vmem:[#allocation7 + $0x570] sm:$0xff] }
  0xad   : > { %686 = vmatpush1.msra.mxu0 %v298_v48  ;;  %757 = vmatpush1.msra.mxu1 %v300_v49  ;;  %v427_v48 = vld [vmem:[#allocation7 + $0x528] sm:$0xff]  ;;  %v429_v49 = vld [vmem:[#allocation7 + $0x538] sm:$0xff] }
  0xae   : > { %687 = vmatprep.subr.mxu0 %v291_v50  ;;  %758 = vmatprep.subr.mxu1 %v293_v51  ;;  %v426_v50 = vld [vmem:[#allocation7 + $0x520] sm:$0xff]  ;;  %v428_v51 = vld [vmem:[#allocation7 + $0x530] sm:$0xff] }
  0xaf   : > { %688 = vmatpush1.msra.mxu0 %v290_v52  ;;  %759 = vmatpush1.msra.mxu1 %v292_v53  ;;  %v419_v52 = vld [vmem:[#allocation7 + $0x4e8] sm:$0xff]  ;;  %v421_v53 = vld [vmem:[#allocation7 + $0x4f8] sm:$0xff] }
  0xb0   : > { %689 = vmatprep.subr.mxu0 %v283_v54  ;;  %760 = vmatprep.subr.mxu1 %v285_v55  ;;  %v418_v54 = vld [vmem:[#allocation7 + $0x4e0] sm:$0xff]  ;;  %v420_v55 = vld [vmem:[#allocation7 + $0x4f0] sm:$0xff] }
  0xb1   : > { %690 = vmatpush1.msra.mxu0 %v282_v57  ;;  %761 = vmatpush1.msra.mxu1 %v284_v58  ;;  %v411_v57 = vld [vmem:[#allocation7 + $0x4a8] sm:$0xff]  ;;  %v413_v58 = vld [vmem:[#allocation7 + $0x4b8] sm:$0xff] }
  0xb2   : > { %691 = vmatprep.subr.mxu0 %v275_v59  ;;  %762 = vmatprep.subr.mxu1 %v277_v60  ;;  %v410_v59 = vld [vmem:[#allocation7 + $0x4a0] sm:$0xff]  ;;  %v412_v60 = vld [vmem:[#allocation7 + $0x4b0] sm:$0xff] }
  0xb3   : > { %692 = vmatpush1.msra.mxu0 %v274_v61  ;;  %763 = vmatpush1.msra.mxu1 %v276_v62  ;;  %v403_v61 = vld [vmem:[#allocation7 + $0x468] sm:$0xff]  ;;  %v405_v62 = vld [vmem:[#allocation7 + $0x478] sm:$0xff] }
  0xb4   : > { %693 = vmatprep.subr.mxu0 %v267_v0  ;;  %764 = vmatprep.subr.mxu1 %v269_v1  ;;  %v402_v0 = vld [vmem:[#allocation7 + $0x460] sm:$0xff]  ;;  %v404_v1 = vld [vmem:[#allocation7 + $0x470] sm:$0xff] }
  0xb5   : > { %694 = vmatpush1.msra.mxu0 %v266_v2  ;;  %765 = vmatpush1.msra.mxu1 %v268_v3  ;;  %v395_v2 = vld [vmem:[#allocation7 + $0x428] sm:$0xff]  ;;  %v397_v3 = vld [vmem:[#allocation7 + $0x438] sm:$0xff] }
  0xb6   : > { %695 = vmatprep.subr.mxu0 %v515_v4  ;;  %766 = vmatprep.subr.mxu1 %v517_v5  ;;  %v394_v4 = vld [vmem:[#allocation7 + $0x420] sm:$0xff]  ;;  %v396_v5 = vld [vmem:[#allocation7 + $0x430] sm:$0xff] }
  0xb7   : > { %696 = vmatpush2.msra.mxu0 %v514_v6  ;;  %767 = vmatpush2.msra.mxu1 %v516_v7  ;;  %v825_v6 = vld [vmem:[%s1424_s29] sm:$0xff]  ;;  %v826_v7 = vld [vmem:[%s1424_s29 + $0x8] sm:$0xff] }
  0xb8   : > { %697 = vmatprep.subr.mxu0 %v507_v8  ;;  %768 = vmatprep.subr.mxu1 %v509_v9  ;;  %v827_v8 = vld [vmem:[%s1424_s29 + $0x10] sm:$0xff]  ;;  %v828_v9 = vld [vmem:[%s1424_s29 + $0x18] sm:$0xff]  ;;  %988 = vst [vmem:[%s260_s20 + $0x20] sm:$0xff] %v825_v6  ;;  %989 = vst [vmem:[%s260_s20 + $0x28] sm:$0xff] %v826_v7 }
  0xb9   : > { %698 = vmatpush2.msra.mxu0 %v506_v10  ;;  %769 = vmatpush2.msra.mxu1 %v508_v11  ;;  %990 = vst [vmem:[%s260_s20 + $0x30] sm:$0xff] %v827_v8  ;;  %991 = vst [vmem:[%s260_s20 + $0x38] sm:$0xff] %v828_v9 }
  0xba   : > { %699 = vmatprep.subr.mxu0 %v499_v12  ;;  %770 = vmatprep.subr.mxu1 %v501_v13 }
  0xbb   : > { %700 = vmatpush2.msra.mxu0 %v498_v14  ;;  %771 = vmatpush2.msra.mxu1 %v500_v15 }
  0xbc   : > { %701 = vmatprep.subr.mxu0 %v491_v16  ;;  %772 = vmatprep.subr.mxu1 %v493_v17 }
  0xbd   : > { %702 = vmatpush2.msra.mxu0 %v490_v18  ;;  %773 = vmatpush2.msra.mxu1 %v492_v19 }
  0xbe   : > { %703 = vmatprep.subr.mxu0 %v483_v20  ;;  %774 = vmatprep.subr.mxu1 %v485_v21 }
  0xbf   : > { %704 = vmatpush2.msra.mxu0 %v482_v22  ;;  %775 = vmatpush2.msra.mxu1 %v484_v23 }
  0xc0   : > { %705 = vmatprep.subr.mxu0 %v475_v24  ;;  %776 = vmatprep.subr.mxu1 %v477_v25 }
  0xc1   : > { %706 = vmatpush2.msra.mxu0 %v474_v26  ;;  %777 = vmatpush2.msra.mxu1 %v476_v27 }
  0xc2   : > { %707 = vmatprep.subr.mxu0 %v467_v28  ;;  %778 = vmatprep.subr.mxu1 %v469_v29 }
  0xc3   : > { %708 = vmatpush2.msra.mxu0 %v466_v30  ;;  %779 = vmatpush2.msra.mxu1 %v468_v31 }
  0xc4   : > { %709 = vmatprep.subr.mxu0 %v459_v32  ;;  %780 = vmatprep.subr.mxu1 %v461_v33 }
  0xc5   : > { %710 = vmatpush2.msra.mxu0 %v458_v34  ;;  %781 = vmatpush2.msra.mxu1 %v460_v35 }
  0xc6   : > { %711 = vmatprep.subr.mxu0 %v451_v36  ;;  %782 = vmatprep.subr.mxu1 %v453_v37 }
  0xc7   : > { %712 = vmatpush2.msra.mxu0 %v450_v38  ;;  %783 = vmatpush2.msra.mxu1 %v452_v39 }
  0xc8   : > { %713 = vmatprep.subr.mxu0 %v443_v40  ;;  %784 = vmatprep.subr.mxu1 %v445_v41 }
  0xc9   : > { %714 = vmatpush2.msra.mxu0 %v442_v42  ;;  %785 = vmatpush2.msra.mxu1 %v444_v43 }
  0xca   : > { %715 = vmatprep.subr.mxu0 %v435_v44  ;;  %786 = vmatprep.subr.mxu1 %v437_v45 }
  0xcb   : > { %716 = vmatpush2.msra.mxu0 %v434_v46  ;;  %787 = vmatpush2.msra.mxu1 %v436_v47 }
  0xcc   : > { %717 = vmatprep.subr.mxu0 %v427_v48  ;;  %788 = vmatprep.subr.mxu1 %v429_v49 }
  0xcd   : > { %718 = vmatpush2.msra.mxu0 %v426_v50  ;;  %789 = vmatpush2.msra.mxu1 %v428_v51 }
  0xce   : > { %719 = vmatprep.subr.mxu0 %v419_v52  ;;  %790 = vmatprep.subr.mxu1 %v421_v53 }
  0xcf   : > { %720 = vmatpush2.msra.mxu0 %v418_v54  ;;  %791 = vmatpush2.msra.mxu1 %v420_v55 }
  0xd0   : > { %721 = vmatprep.subr.mxu0 %v411_v57  ;;  %792 = vmatprep.subr.mxu1 %v413_v58 }
  0xd1   : > { %722 = vmatpush2.msra.mxu0 %v410_v59  ;;  %793 = vmatpush2.msra.mxu1 %v412_v60 }
  0xd2   : > { %723 = vmatprep.subr.mxu0 %v403_v61  ;;  %794 = vmatprep.subr.mxu1 %v405_v62 }
  0xd3   : > { %724 = vmatpush2.msra.mxu0 %v402_v0  ;;  %795 = vmatpush2.msra.mxu1 %v404_v1 }
  0xd4   : > { %725 = vmatprep.subr.mxu0 %v395_v2  ;;  %796 = vmatprep.subr.mxu1 %v397_v3 }
  0xd5   : > { %726 = vmatpush2.msra.mxu0 %v394_v4  ;;  %727 = vmatprep.mubr.f32.mxu0 %v1439_v63 }
  0xd6   : > { %797 = vmatpush2.msra.mxu1 %v396_v5  ;;  %798 = vmatprep.mubr.f32.mxu1 %v1439_v63 }
  0xd7   : > { %728 = vmatmul.mubr.f32.vlgmr.msra.gmra.mxu0 %v1435_v56  ;;  %799 = vmatmul.mubr.f32.vlgmr.msra.gmra.mxu1 %v1435_v56 }
 0x155   : > { %v587_v10 = vpop.f32.mrf.mxu0  ;;  %v658_v11 = vpop.f32.mrf.mxu1 }
 0x157   : > { %v589_v12 = vpop.f32.mrf.mxu0  ;;  %v660_v13 = vpop.f32.mrf.mxu1 }
 0x158   : > { %v813_v63 = vcombine.low %v587_v10, %v589_v12  ;;  %v814_v14 = vcombine.low %v658_v11, %v660_v13 }
 0x15a   : > { %821 = vst [vmem:[%s260_s20] sm:$0xff] %v813_v63  ;;  %822 = vst [vmem:[%s260_s20 + $0x8] sm:$0xff] %v814_v14 }
 0x197   : > { %v729_v56 = vpop.f32.mrf.mxu0  ;;  %v800_v15 = vpop.f32.mrf.mxu1 }
 0x199   : > { %v731_v16 = vpop.f32.mrf.mxu0  ;;  %v802_v17 = vpop.f32.mrf.mxu1 }
 0x19a   : > { %v815_v18 = vcombine.low %v729_v56, %v731_v16  ;;  %v816_v19 = vcombine.low %v800_v15, %v802_v17 }
 0x19c   : > { %823 = vst [vmem:[%s260_s20 + $0x10] sm:$0xff] %v815_v18  ;;  %824 = vst [vmem:[%s260_s20 + $0x18] sm:$0xff] %v816_v19 }
 0x19d   : > { %1178 = shalt.err (!%p1175_p6)
}
 0x19e   : > { %s1179_s6 = scalar_lea.hbm %s1460_s24, 1024  ;;  %s1183_s30 = scalar_lea.hbm %s1511_s3, 2048 }
 0x19f   : > { %p1180_p9 = scmp.ne.s32.totalorder %s1460_s24, %s1179_s6  ;;  %p1184_p11 = scmp.lt.s32.totalorder %s1460_s24, %s1511_s3 }
 0x1a0   : > { %p1185_p3 = scmp.lt.s32.totalorder %s1183_s30, %s1179_s6 }
 0x1a1   : > { %p1181_p12 = pnand %p1180_p9, %p1366_p0 }
 0x1a2   : > { %p1186_p1 = por %p1185_p3, %p1184_p11 }
 0x1a3   : > { %p1182_p13 = pneg %p1181_p12 }
 0x1a5   : > { %p1187_p4 = pnand %p1186_p1, %p1182_p13 }
 0x1a7   : > { %1190 = shalt.err (!%p1187_p4)
}
 0x1a8   : > { %s1261_s26 = smov 512   ;;  %s1262_s29 = smov 32  }
 0x1a9   : > { %1008 = dma.vmem_to_hbm [thread:$0]  (%p1366_p0), %s1455_s4, 1024, %s1460_s24, %s835_s27, %s1261_s26, %s1261_s26, %s1262_s29  }
 0x1aa PF: > { %s865_s18 = sand.u32 1, %s1233_s12   ;;  %p1526_p8 = scmp.ne.s32.totalorder %s1516_s21, 0 }
 0x1ab   : > { %s866_s20 = scalar_lea.sflag [#allocation4], %s865_s18 }
 0x1ac   : > { %p1022_p5 = pnand %p976_p10, %p1526_p8 }
 0x1ae   : > { %p1023_p7 = pneg %p1022_p5 }
 0x1b0   : > { %1228 = dma.done.wait (%p1023_p7), %s866_s20, 1024  }
 0x1b1   : > { %1230 = vsyncadd (%p1023_p7), %s866_s20, 4294966272  ;;  %s22_s17 = sadd.s32 1, %s1253_s17   ;;  %s1527_s7 = sld [smem:[#allocation13_spill]] }
 0x1b2   : > { %p19_p2 = scmp.ge.s32.totalorder %s22_s17, 4   ;;  %s1528_s12 = smov %s1237_s13 }
 0x1b3   : > { %s1529_s13 = smov %s1241_s14  ;;  %s1530_s14 = smov %s1378_s11 }
 0x1b4   : > { %s1531_s15 = smov %s1249_s16  ;;  %21 = sbr.rel (!%p19_p2) target bundleno = 11 (0xb), region = 95 }
 0x1b7   : > { %s1532_s16 = smov %s1527_s7 }
 0x1b9   :  { %871 = vsyncpa [#allocation3], 1 }
 0x1ba   :  { %873 = vsyncpa [#allocation3 + $0x1], 1 }
 0x1bb   :  { %874 = vsyncpa [#allocation6], 1 }
 0x1bc   :  { %876 = vsyncpa [#allocation6 + $0x1], 1 }
 0x1bd   :  { %877 = vsyncpa [#allocation4], 1 }
 0x1be   :  { %879 = vsyncpa [#allocation4 + $0x1], 1 }

</bundles_post_ra>
